<compile_context>
chip_gen: v7x
topology: tpu7x:2x2x1
jax: 0.10.0
libtpu: 0.0.40
codegen_flags: <defaults>
</compile_context>

<pallas_src>
import functools

import jax
import jax.numpy as jnp
from jax.experimental import pallas as pl
from jax.experimental.pallas import tpu as pltpu


def _round_up(x, m):
    return (x + m - 1) // m * m


def _generate_node_kernel(labels_ref, q_ref, c_ref, w_ref, b_ref, out_ref, *,
                          op_size):
    """Fused GenerateNode forward (eval mode), one MXU matmul.

    x   = [q | c | one_hot(clamp(label, max=op_size-1))]          [tb, 2H+V]
    z   = x @ W_aug + b_aug      (cols l | r | lg | rg | tok)     [tb, 4H+E]
    out = [tanh(z[:, :2H]) * sigmoid(z[:, 2H:4H]) | z[:, 4H:]]    [tb, 2H+E]
    """
    h = q_ref.shape[-1]
    v = w_ref.shape[0] - 2 * h
    # torch.clamp(node_label, max=op_size-1); labels assumed >= 0 (as in PyTorch,
    # where a negative index would be an error).
    labels = jnp.minimum(labels_ref[...], op_size - 1)             # [tb, 1] int32
    ids = jax.lax.broadcasted_iota(jnp.int32, (1, v), 1)           # [1, V]
    onehot = (labels == ids).astype(w_ref.dtype)                   # [tb, V]

    x = jnp.concatenate(
        [q_ref[...].astype(w_ref.dtype),
         c_ref[...].astype(w_ref.dtype),
         onehot], axis=-1)                                         # [tb, 2H+V]

    z = jnp.dot(x, w_ref[...], preferred_element_type=jnp.float32) + b_ref[...]

    gated = jnp.tanh(z[:, :2 * h]) * jax.nn.sigmoid(z[:, 2 * h:4 * h])  # [tb, 2H]
    out_ref[...] = jnp.concatenate([gated, z[:, 4 * h:]], axis=-1
                                   ).astype(out_ref.dtype)         # [tb, 2H+E]


def generate_node_pallas(node_label, q, c, prepared, *, op_size, hidden_size,
                         num_cores=None, max_block_rows=1024):
    """node_label [B] int, q/c [B,H] -> fused slab [B, 2H+E] = (l | r | tok)."""
    B, H = q.shape
    assert H == hidden_size
    w_aug = prepared["w_aug"]                      # [2H+V, 4H+E]
    b_aug = prepared["b_aug"]                      # [1, 4H+E] f32
    d_in, d_out = w_aug.shape
    E = d_out - 4 * H
    out_w = 2 * H + E

    labels2d = node_label.reshape(B, 1).astype(jnp.int32)
    kernel = functools.partial(_generate_node_kernel, op_size=op_size)
    out_shape = jax.ShapeDtypeStruct((B, out_w), q.dtype)

    # Advisory cost estimate: real dtype sizes, each operand counted once.
    bytes_accessed = (labels2d.size * labels2d.dtype.itemsize
                      + q.size * q.dtype.itemsize
                      + c.size * c.dtype.itemsize
                      + w_aug.size * w_aug.dtype.itemsize
                      + b_aug.size * b_aug.dtype.itemsize
                      + B * out_w * q.dtype.itemsize)
    cost = pl.CostEstimate(flops=2 * B * d_in * d_out,
                           transcendentals=B * 4 * H,
                           bytes_accessed=bytes_accessed)

    if num_cores is None:
        num_cores = int(getattr(jax.devices()[0], "num_cores", 1) or 1)
    want_core_split = num_cores > 1 and B >= 16 * num_cores
    n_blocks = max(pl.cdiv(B, max_block_rows), num_cores if want_core_split else 1)

    if n_blocks <= 1:
        # Single-TensorCore / small-B path: whole problem resident in VMEM, no
        # grid pipeline machinery (a grid is a serial loop on v5e/v6e anyway).
        vmem = pltpu.MemorySpace.VMEM
        return pl.pallas_call(
            kernel,
            out_shape=out_shape,
            in_specs=[pl.BlockSpec(memory_space=vmem)] * 5,
            out_specs=pl.BlockSpec(memory_space=vmem),
            cost_estimate=cost,
        )(labels2d, q, c, w_aug, b_aug)

    # Multi-block path: balanced, multiple-of-8 row blocks split "parallel"
    # across TensorCores; weights/bias stay VMEM-resident (constant index_map).
    # No wrapper-side padding: the boundary block uses masked partial reads and
    # out-of-bounds output rows are dropped by Pallas.
    tile_b = _round_up(pl.cdiv(B, n_blocks), 8)
    grid = (pl.cdiv(B, tile_b),)
    return pl.pallas_call(
        kernel,
        out_shape=out_shape,
        grid=grid,
        in_specs=[
            pl.BlockSpec((tile_b, 1), lambda i: (i, 0)),       # labels
            pl.BlockSpec((tile_b, H), lambda i: (i, 0)),       # q
            pl.BlockSpec((tile_b, H), lambda i: (i, 0)),       # c
            pl.BlockSpec((d_in, d_out), lambda i: (0, 0)),     # W_aug (resident)
            pl.BlockSpec((1, d_out), lambda i: (0, 0)),        # b_aug (resident)
        ],
        out_specs=pl.BlockSpec((tile_b, out_w), lambda i: (i, 0)),
        compiler_params=pltpu.CompilerParams(
            dimension_semantics=("parallel",)),
        cost_estimate=cost,
    )(labels2d, q, c, w_aug, b_aug)


def generate_node_forward(current_embedding, node_label, current_context,
                          prepared, op_size, hidden_size, **kw):
    """Full GenerateNode.forward (eval mode).

    current_embedding: [B, 1, H]; node_label: [B] int; current_context: [B, 1, H]
    prepared: output of prepare_generate_node (augmented fused weight/bias).
    Returns (l_child [B,H], r_child [B,H], token_embedding [B,E]).
    """
    q = current_embedding[:, 0, :]   # squeeze(1)
    c = current_context[:, 0, :]     # squeeze(1)
    # Dropout -> identity (eval mode).
    out = generate_node_pallas(node_label, q, c, prepared,
                               op_size=op_size, hidden_size=hidden_size, **kw)
    H = hidden_size
    return out[:, :H], out[:, H:2 * H], out[:, 2 * H:]


def init_params(key, embedding_size, hidden_size):
    """PyTorch Linear weight is [out, in]; store fused transposed [D, 4H] with
    column blocks ordered (l | r | lg | rg), plus fused bias [1, 4H]."""
    D = 2 * hidden_size + embedding_size
    keys = jax.random.split(key, 8)
    scale = 1.0 / jnp.sqrt(D)
    ws, bs = [], []
    for i in range(4):  # order: l, r, lg, rg
        w = jax.random.uniform(keys[2 * i], (hidden_size, D),
                               minval=-scale, maxval=scale, dtype=jnp.float32)
        b = jax.random.uniform(keys[2 * i + 1], (hidden_size,),
                               minval=-scale, maxval=scale, dtype=jnp.float32)
        ws.append(w.T)          # [D, H]
        bs.append(b)
    return {"w_fused": jnp.concatenate(ws, axis=1),            # [D, 4H]
            "b_fused": jnp.concatenate(bs, axis=0)[None, :]}   # [1, 4H]


def prepare_generate_node(params, embedding_table, *, hidden_size,
                          weight_dtype=jnp.float32):
    """Fold the embedding gather into ONE augmented weight (done once at setup):

        W_aug = [[ W_q  , 0 ],
                 [ W_c  , 0 ],
                 [ T@W_e, T ]]     b_aug = [b_fused | 0]

    so the kernel's single matmul  [q|c|onehot] @ W_aug  yields  [z | tok].
    Bias stays f32; accumulation in the kernel is always f32.
    """
    H = hidden_size
    w_fused = params["w_fused"]          # [2H+E, 4H]
    b_fused = params["b_fused"]          # [1, 4H]
    V, E = embedding_table.shape
    w_qc = w_fused[:2 * H]               # [2H, 4H]
    w_e = w_fused[2 * H:]                # [E, 4H]
    top = jnp.concatenate([w_qc, jnp.zeros((2 * H, E), w_fused.dtype)], axis=1)
    bot = jnp.concatenate([embedding_table @ w_e, embedding_table], axis=1)
    w_aug = jnp.concatenate([top, bot], axis=0).astype(weight_dtype)  # [2H+V, 4H+E]
    b_aug = jnp.concatenate(
        [b_fused, jnp.zeros((1, E), b_fused.dtype)], axis=1).astype(jnp.float32)
    return {"w_aug": w_aug, "b_aug": b_aug}


def _reference(current_embedding, node_label, current_context,
               embedding_op_const, params, op_size, hidden_size):
    """Pure-JAX reference matching the PyTorch module (eval mode)."""
    H = hidden_size
    q = current_embedding[:, 0, :]
    c = current_context[:, 0, :]
    tok = embedding_op_const[jnp.minimum(node_label, op_size - 1)]
    x = jnp.concatenate([q, c, tok], axis=1)
    z = x @ params["w_fused"] + params["b_fused"]
    l = jnp.tanh(z[:, :H]) * jax.nn.sigmoid(z[:, 2 * H:3 * H])
    r = jnp.tanh(z[:, H:2 * H]) * jax.nn.sigmoid(z[:, 3 * H:])
    return l, r, tok


if __name__ == "__main__":
    hidden_size = 32          # cfg.decoder_hidden_size
    embedding_size = 32       # cfg.decoder_embedding_size
    op_size = 5               # number of operator tokens
    vocab_op_const = 12       # embedding table rows (>= op_size)

    key = jax.random.PRNGKey(0)
    k_emb, k_p = jax.random.split(key, 2)
    embedding_op_const = jax.random.normal(
        k_emb, (vocab_op_const, embedding_size), dtype=jnp.float32)
    params = init_params(k_p, embedding_size, hidden_size)
    prep_f32 = prepare_generate_node(params, embedding_op_const,
                                     hidden_size=hidden_size)
    prep_bf16 = prepare_generate_node(params, embedding_op_const,
                                      hidden_size=hidden_size,
                                      weight_dtype=jnp.bfloat16)

    ok = True
    cases = [
        # (B, prepared, extra kwargs, atol)
        (8, prep_f32, {}, 1e-5),                              # small, grid-less
        (200, prep_f32, {}, 1e-5),                            # auto routing
        (200, prep_f32, {"max_block_rows": 64}, 1e-5),        # force grid path
        (200, prep_bf16, {}, 6e-2),                           # bf16 weights
    ]
    for B, prepared, kw, atol in cases:
        kq, kc, kl = jax.random.split(jax.random.fold_in(key, B + len(kw)), 3)
        current_embedding = jax.random.normal(kq, (B, 1, hidden_size),
                                              dtype=jnp.float32)
        current_context = jax.random.normal(kc, (B, 1, hidden_size),
                                            dtype=jnp.float32)
        node_label = jax.random.randint(kl, (B,), 0, vocab_op_const,
                                        dtype=jnp.int32)

        l_child, r_child, token_embedding = generate_node_forward(
            current_embedding, node_label, current_context, prepared,
            op_size, hidden_size, **kw)
        jax.block_until_ready((l_child, r_child, token_embedding))

        l_ref, r_ref, tok_ref = _reference(
            current_embedding, node_label, current_context,
            embedding_op_const, params, op_size, hidden_size)

        ok &= bool(jnp.allclose(l_child, l_ref, atol=atol))
        ok &= bool(jnp.allclose(r_child, r_ref, atol=atol))
        ok &= bool(jnp.allclose(token_embedding, tok_ref, atol=atol))
        ok &= l_child.shape == (B, hidden_size)
        ok &= r_child.shape == (B, hidden_size)
        ok &= token_embedding.shape == (B, embedding_size)

    assert ok, "mismatch vs pure-JAX reference"
    print("KERNEL_OK")
</pallas_src>

<mosaic_0001>
module attributes {stable_mosaic.version = 11 : i64} {
  func.func @_generate_node_kernel(%arg0: memref<8x1xi32, #tpu.memory_space<vmem>>, %arg1: memref<8x32xf32, #tpu.memory_space<vmem>>, %arg2: memref<8x32xf32, #tpu.memory_space<vmem>>, %arg3: memref<76x160xf32, #tpu.memory_space<vmem>>, %arg4: memref<1x160xf32, #tpu.memory_space<vmem>>, %arg5: memref<8x96xf32, #tpu.memory_space<vmem>>) attributes {dimension_semantics = [], scalar_prefetch = 0 : i64, scratch_operands = 0 : i64, tpu.core_type = #tpu.core_type<tc>} {
    %c0 = arith.constant 0 : index
    %c0_0 = arith.constant 0 : index
    %0 = vector.load %arg0[%c0, %c0_0] : memref<8x1xi32, #tpu.memory_space<vmem>>, vector<8x1xi32>
    %c4_i32 = arith.constant 4 : i32
    %1 = vector.broadcast %c4_i32 : i32 to vector<8x1xi32>
    %2 = arith.minsi %0, %1 : vector<8x1xi32>
    %3 = tpu.iota {dimensions = array<i32: 1>} : vector<1x12xi32>
    %4 = vector.broadcast %2 : vector<8x1xi32> to vector<8x12xi32>
    %5 = vector.broadcast %3 : vector<1x12xi32> to vector<8x12xi32>
    %6 = arith.cmpi eq, %4, %5 : vector<8x12xi32>
    %7 = arith.extui %6 : vector<8x12xi1> to vector<8x12xi32>
    %8 = arith.sitofp %7 : vector<8x12xi32> to vector<8x12xf32>
    %c0_1 = arith.constant 0 : index
    %c0_2 = arith.constant 0 : index
    %9 = vector.load %arg1[%c0_1, %c0_2] : memref<8x32xf32, #tpu.memory_space<vmem>>, vector<8x32xf32>
    %c0_3 = arith.constant 0 : index
    %c0_4 = arith.constant 0 : index
    %10 = vector.load %arg2[%c0_3, %c0_4] : memref<8x32xf32, #tpu.memory_space<vmem>>, vector<8x32xf32>
    %11 = tpu.concatenate %9, %10, %8 in 1 : vector<8x32xf32>, vector<8x32xf32>, vector<8x12xf32> -> vector<8x76xf32>
    %c0_5 = arith.constant 0 : index
    %c0_6 = arith.constant 0 : index
    %12 = vector.load %arg3[%c0_5, %c0_6] : memref<76x160xf32, #tpu.memory_space<vmem>>, vector<76x160xf32>
    %cst = arith.constant dense<0.000000e+00> : vector<8x160xf32>
    %13 = tpu.matmul %11, %12, %cst {dimension_numbers = #tpu.dot_dimension_numbers<[1], [0], [0], [1], [0, 0, 1, 1], [], []>} : vector<8x76xf32>, vector<76x160xf32>, vector<8x160xf32> -> vector<8x160xf32>
    %c0_7 = arith.constant 0 : index
    %c0_8 = arith.constant 0 : index
    %14 = vector.load %arg4[%c0_7, %c0_8] : memref<1x160xf32, #tpu.memory_space<vmem>>, vector<1x160xf32>
    %15 = vector.broadcast %14 : vector<1x160xf32> to vector<8x160xf32>
    %16 = arith.addf %13, %15 : vector<8x160xf32>
    %17 = vector.extract_strided_slice %16 {offsets = [0, 0], sizes = [8, 64], strides = [1, 1]} : vector<8x160xf32> to vector<8x64xf32>
    %18 = math.tanh %17 : vector<8x64xf32>
    %19 = vector.extract_strided_slice %16 {offsets = [0, 64], sizes = [8, 64], strides = [1, 1]} : vector<8x160xf32> to vector<8x64xf32>
    %20 = arith.negf %19 : vector<8x64xf32>
    %21 = math.exp %20 : vector<8x64xf32>
    %cst_9 = arith.constant 1.000000e+00 : f32
    %22 = vector.broadcast %cst_9 : f32 to vector<8x64xf32>
    %23 = arith.addf %22, %21 : vector<8x64xf32>
    %24 = arith.divf %22, %23 : vector<8x64xf32>
    %25 = arith.mulf %18, %24 : vector<8x64xf32>
    %26 = vector.extract_strided_slice %16 {offsets = [0, 128], sizes = [8, 32], strides = [1, 1]} : vector<8x160xf32> to vector<8x32xf32>
    %27 = tpu.concatenate %25, %26 in 1 : vector<8x64xf32>, vector<8x32xf32> -> vector<8x96xf32>
    %c0_10 = arith.constant 0 : index
    %c0_11 = arith.constant 0 : index
    %28 = vector.load %arg5[%c0_10, %c0_11] : memref<8x96xf32, #tpu.memory_space<vmem>>, vector<8x96xf32>
    tpu.vector_store %arg5[%c0_10, %c0_11], %27 {strides = array<i32>} : memref<8x96xf32, #tpu.memory_space<vmem>>, vector<8x96xf32>,
    return
  }
}

</mosaic_0001>

<bundles_post_ra>
// kernel: tpu_custom_call.1
= control target key start
LH: loop header
LB: loop body
LE: loop exit
PB: predicated region body
PF: predicated region fallthrough
CT: control target
= control target key end

     0   :  { %10 = vsyncpa [#allocation3], 0  ;;  %s376_s0 = inlined_call_operand.vmem [shape: s32[8,1], index: 0, kind: input, shape index: {}]   ;;  %s377_s1 = inlined_call_operand.vmem [shape: f32[8,32], index: 1, kind: input, shape index: {}]   ;;  %s378_s2 = inlined_call_operand.vmem [shape: f32[8,32], index: 2, kind: input, shape index: {}]   ;;  %s379_s3 = inlined_call_operand.hbm [shape: f32[76,160], index: 3, kind: input, shape index: {}]   ;;  %s380_s4 = inlined_call_operand.vmem [shape: f32[1,160], index: 4, kind: input, shape index: {}]   ;;  %s381_s5 = inlined_call_operand.hbm [shape: f32[8,96], index: 5, kind: output, shape index: {}]  }
   0x1   :  { %11 = vsyncpa [#allocation4], 0  ;;  %s299_s18 = smov [#allocation2]   ;;  %s251_s22 = scalar_lea.hbm %s379_s3, 2560 }
   0x2   :  { %s23_s19 = sshll.u32 %s299_s18, 4  ;;  %p252_p0 = scmp.ne.s32.totalorder %s379_s3, %s251_s22  ;;  %s24_s19 = int_to_ptr.vmem [resolvable:$true] %s23_s19 }
   0x3   :  { %p255_p1 = scmp.lt.u32.totalorder %s251_s22, %s379_s3 }
   0x5   :  { %p257_p2 = pnand %p255_p1, %p252_p0 }
   0x7   :  { %260 = shalt.err (!%p257_p2)
}
   0x8   :  { %s261_s27 = scalar_lea.vmem %s24_s19, 2560  ;;  %p266_p4 = scmp.lt.s32.totalorder %s24_s19, %s24_s19 }
   0x9   :  { %p262_p3 = scmp.ne.s32.totalorder %s24_s19, %s261_s27  ;;  %p267_p5 = scmp.lt.s32.totalorder %s261_s27, %s261_s27 }
   0xb   :  { %p268_p6 = por %p267_p5, %p266_p4 }
   0xd   :  { %p269_p7 = pnand %p268_p6, %p262_p3 }
   0xf   :  { %272 = shalt.err (!%p269_p7)
}
  0x10   :  { %s300_s28 = smov 256   ;;  %s301_s29 = smov 16  }
  0x11   :  { %29 = dma.hbm_to_vmem [thread:$0]  %s379_s3, 2560, %s24_s19, [#allocation3], %s300_s28, %s300_s28, %s301_s29  }
  0x12   :  { %295 = dma.done.wait [#allocation3], 2560  }
  0x13   :  { %296 = vsyncadd [#allocation3], 4294964736  ;;  %v302_v0 = vmov 0   ;;  %v35_v1 = vld [vmem:[%s376_s0] sm:$0xff]  ;;  %v303_v4 = vmov 0.0   ;;  %v63_v6 = vld [vmem:[#allocation2 + $0x18] sm:$0xff]  ;;  %v38_v35 = vlaneseq }
  0x14   :  { %244 = vset.pattern.permute.xlu0 %v302_v0  ;;  %vm36_vm0 = vcmp.lt.s32.totalorder %v35_v1, 4  ;;  %v47_v3 = vld [vmem:[%s378_s2] sm:$0xff]  ;;  %167 = vmatprep.mubr.f32.mxu0 %v303_v4  ;;  %v60_v7 = vld [vmem:[#allocation2] sm:$0xff]  ;;  %v62_v9 = vld [vmem:[#allocation2 + $0x10] sm:$0xff]  ;;  %s304_s3 = smov 32   ;;  %vm96_vm1 = vcmask 1043456  }
  0x15   :  { %v37_v2 = vsel %vm36_vm0, %v35_v1, 4  ;;  %v61_v5 = vld [vmem:[#allocation2 + $0x8] sm:$0xff]  ;;  %v67_v11 = vld [vmem:[#allocation2 + $0x38] sm:$0xff]  ;;  %v215_v12 = vpack.c.bf16 %v62_v9, %v60_v7  ;;  %v64_v14 = vld [vmem:[#allocation2 + $0x20] sm:$0xff]  ;;  %vm305_vm2 = vmmov 1   ;;  %v39_v36 = vand.u32 127, %v38_v35 }
  0x16   :  { %41 = vperm.xlu0 %244, %v37_v2   ;;  %v213_v8 = vpack.c.bf16 %v63_v6, %v61_v5  ;;  %v65_v10 = vld [vmem:[#allocation2 + $0x28] sm:$0xff]  ;;  %v66_v15 = vld [vmem:[#allocation2 + $0x30] sm:$0xff]  ;;  %v71_v17 = vld [vmem:[#allocation2 + $0x58] sm:$0xff]  ;;  %s306_s0 = smov 64   ;;  %vm56_vm5 = vcmask 261120   ;;  %vm58_vm6 = vcmask 523264  }
  0x17   :  { %v217_v13 = vpack.c.bf16 %v67_v11, %v65_v10  ;;  %v69_v16 = vld [vmem:[#allocation2 + $0x48] sm:$0xff]  ;;  %v219_v18 = vpack.c.bf16 %v66_v15, %v64_v14  ;;  %v68_v20 = vld [vmem:[#allocation2 + $0x40] sm:$0xff]  ;;  %v70_v21 = vld [vmem:[#allocation2 + $0x50] sm:$0xff]  ;;  %vm92_vm7 = vcmask 621568   ;;  %v83_v44 = vshrl.u32 %v38_v35, 7 }
  0x18   :  { %214 = vmatprep.subr.bf16.mxu0 %v213_v8  ;;  %v221_v19 = vpack.c.bf16 %v71_v17, %v69_v16  ;;  %v73_v22 = vld [vmem:[#allocation2 + $0x68] sm:$0xff]  ;;  %v75_v23 = vld [vmem:[#allocation2 + $0x78] sm:$0xff]  ;;  %v223_v24 = vpack.c.bf16 %v70_v21, %v68_v20  ;;  %v72_v26 = vld [vmem:[#allocation2 + $0x60] sm:$0xff]  ;;  %vm191_vm8 = vcmask 785408  }
  0x19   :  { %216 = vmatpush1.bf16.msra.mxu0 %v215_v12  ;;  %v225_v25 = vpack.c.bf16 %v75_v23, %v73_v22  ;;  %v74_v27 = vld [vmem:[#allocation2 + $0x70] sm:$0xff]  ;;  %v77_v28 = vld [vmem:[#allocation2 + $0x88] sm:$0xff]  ;;  %v79_v29 = vld [vmem:[#allocation2 + $0x98] sm:$0xf]  ;;  %v84_v45 = vsub.s32 0, %v83_v44  ;;  %v88_v47 = vsub.s32 1, %v83_v44 }
  0x1a   :  { %49 = vrot.lane.b32.xlu0 %v47_v3, %s304_s3  ;;  %218 = vmatprep.subr.bf16.mxu0 %v217_v13  ;;  %v227_v30 = vpack.c.bf16 %v74_v27, %v72_v26  ;;  %v229_v31 = vpack.c.bf16 %v79_v29, %v77_v28  ;;  %v76_v32 = vld [vmem:[#allocation2 + $0x80] sm:$0xff]  ;;  %v78_v33 = vld [vmem:[#allocation2 + $0x90] sm:$0xf]  ;;  %vm230_vm3 = vmpackc.low %vm96_vm1, %vm305_vm2 }
  0x1b   :  { %v232_v34 = vpack.c.bf16 %v78_v33, %v76_v32  ;;  %v46_v39 = vld [vmem:[%s377_s1] sm:$0xff]  ;;  %s307_s1 = smov [#allocation5]  }
  0x1c   :  { %v80_v46 = vld [vmem:[%s380_s4] sm:$0x3]  ;;  %s199_s14 = sshll.u32 %s307_s1, 4  ;;  %s200_s14 = int_to_ptr.vmem [resolvable:$true] %s199_s14 }
  0x1d   :  { %220 = vmatpush1.bf16.msra.mxu0 %v219_v18  ;;  %v85_v48 = vrot.slane %v80_v46, %v84_v45  ;;  %v89_v49 = vrot.slane %v80_v46, %v88_v47  ;;  %s273_s4 = scalar_lea.vmem %s200_s14, 128  ;;  %p278_p9 = scmp.lt.s32.totalorder %s200_s14, %s200_s14 }
  0x1e   :  { %222 = vmatprep.subr.bf16.mxu0 %v221_v19  ;;  %p274_p8 = scmp.ne.s32.totalorder %s200_s14, %s273_s4  ;;  %p279_p10 = scmp.lt.s32.totalorder %s273_s4, %s273_s4 }
  0x20   :  { %p280_p11 = por %p279_p10, %p278_p9 }
  0x21   :  { %224 = vmatpush1.bf16.msra.mxu0 %v223_v24 }
  0x22   :  { %226 = vmatprep.subr.bf16.mxu0 %v225_v25  ;;  %p281_p12 = pnand %p280_p11, %p274_p8 }
  0x25   :  { %228 = vmatpush1.bf16.msra.mxu0 %v227_v30 }
  0x26   :  { %231 = vmatprep.subr.msk.bf16.mxu0 %vm230_vm3, %v229_v31 }
  0x29   :  { %234 = vmatpush1.bf16.msk.msra.mxu0 %vm230_vm3, %v232_v34 }
  0x95   :  { %v42_v37 = vpop.permute.xlu0 %41 }
  0x96   :  { %vm43_vm4 = vcmp.eq.s32.totalorder %v42_v37, %v39_v36 }
  0x97   :  { %v208_v38 = vsel %vm43_vm4, 1.0, %v303_v4 }
  0x98   :  { %53 = vrot.lane.b32.xlu1 %v208_v38, %s306_s0 }
  0x99   :  { %v50_v40 = vpop.permute.xlu0 %49 }
  0x9a   :  { %v57_v41 = vsel %vm56_vm5, %v46_v39, %v50_v40 }
 0x10a   :  { %v54_v42 = vpop.permute.xlu1 %53 }
 0x10b   :  { %v59_v43 = vsel %vm58_vm6, %v57_v41, %v54_v42 }
 0x10c   :  { %211 = vmatmul.mubr.msk.f32.vlgmr.msra.gmra.mrb[0].mxu0 %vm92_vm7, %v59_v43 }
 0x1df   :  { %v169_v50 = vpop.f32.mrb[0].mxu0 }
 0x1e0   :  { %v170_v51 = vadd.f32 %v169_v50, %v85_v48  ;;  %v171_v52 = vpop.f32.mrb[1].mxu0 }
 0x1e1   :  { %v172_v53 = vadd.f32 %v171_v52, %v89_v49 }
 0x1e2   :  { %v212_v54 = vmul.f32 -1.442695, %v170_v51 }
 0x1e3   :  { %187 = vrot.lane.b32.xlu0 %v172_v53, %s306_s0 }
 0x1e4   :  { %245 = vpow2.f32 %v212_v54 }
 0x1ee   :  { %v246_v55 = vpop.eup %245 }
 0x1ef   :  { %v178_v56 = vadd.f32 1.0, %v246_v55 }
 0x1f1   :  { %247 = vrcp.f32 %v178_v56 }
 0x1f2   :  { %249 = vtanh.f32 %v170_v51 }
 0x1fb   :  { %v248_v57 = vpop.eup %247 }
 0x1fc   :  { %182 = vrot.lane.b32.xlu1 %v248_v57, %s306_s0  ;;  %v250_v58 = vpop.eup %249 }
 0x255   :  { %v188_v61 = vpop.permute.xlu0 %187 }
 0x26e   :  { %v183_v59 = vpop.permute.xlu1 %182 }
 0x26f   :  { %v185_v60 = vmul.f32 %v250_v58, %v183_v59 }
 0x271   :  { %v190_v62 = vsel %vm58_vm6, %v185_v60, %v188_v61 }
 0x272   :  { %192 = vst.msk [vmem:[#allocation5] sm:$0xff] %vm191_vm8, %v190_v62 }
 0x273   :  { %284 = shalt.err (!%p281_p12)
}
 0x274   :  { %s285_s17 = scalar_lea.hbm %s381_s5, 128 }
 0x275   :  { %p286_p13 = scmp.ne.s32.totalorder %s381_s5, %s285_s17  ;;  %p289_p0 = scmp.lt.u32.totalorder %s285_s17, %s381_s5 }
 0x277   :  { %p291_p1 = pnand %p289_p0, %p286_p13 }
 0x279   :  { %294 = shalt.err (!%p291_p1)
}
 0x27a   :  { %202 = dma.vmem_to_hbm [thread:$0]  %s200_s14, 128, %s381_s5, [#allocation4]  }
 0x27b   :  { %297 = dma.done.wait [#allocation4], 128  }
 0x27c   :  { %298 = vsyncadd [#allocation4], 4294967168 }
 0x27d   :  { %206 = vsyncpa [#allocation3], 1 }
 0x27e   :  { %207 = vsyncpa [#allocation4], 1 }

</bundles_post_ra>
